<compile_context>
chip_gen: v7x
topology: tpu7x:2x2x1
jax: 0.10.0
libtpu: 0.0.40
codegen_flags: <defaults>
</compile_context>

<pallas_src>
from functools import partial

import jax
import jax.numpy as jnp
from jax.experimental import pallas as pl
from jax.experimental.pallas import tpu as pltpu


# ----------------------------- Pallas kernel ------------------------------- #

def fused_lstm_sentiment_kernel(ids_ref, embp_ref, whh_ref, wd_ref, bd_ref,
                                out_ref, *, B, BP, T):
    """Fused gather + LSTM recurrence + dense + log_softmax (last timestep).

    ids_ref : (T*BP, 1) int32  time-major, batch padded to BP (row t*BP+b)
    embp_ref: (Vp, 4H)  f32    embedding @ W_ih^T + (b_ih + b_hh), vocab padded
    whh_ref : (H, 4H)   f32    W_hh^T  (PyTorch gate order i, f, g, o)
    wd_ref  : (H, L)    f32    dense weight transposed
    bd_ref  : (1, L)    f32    dense bias
    out_ref : (B, L)    f32    log_softmax(dense(h_{T-1}))
    """
    Vp, G4 = embp_ref.shape
    H = whh_ref.shape[0]
    TBP = T * BP

    # In-kernel gather + input projection + bias for ALL timesteps in one MXU
    # pass: one-hot(ids) @ emb_proj.  Row selection by an exact one-hot is
    # numerically exact.
    ids = ids_ref[...]                                               # (T*BP, 1)
    vocab_iota = jax.lax.broadcasted_iota(jnp.int32, (TBP, Vp), 1)   # (T*BP, Vp)
    onehot = jnp.where(vocab_iota == ids, 1.0, 0.0)                  # f32
    xproj = jnp.dot(onehot, embp_ref[...],
                    preferred_element_type=jnp.float32)              # (T*BP, 4H)

    whh = whh_ref[...]                                               # (H, 4H)

    h = jnp.zeros((BP, H), jnp.float32)
    c = jnp.zeros((BP, H), jnp.float32)

    # Statically unrolled recurrence (T is small and trace-time constant).
    # TODO(synk): for large T/B carry xproj in a pltpu.VMEM((T, BP, 4H)) scratch
    # and switch to lax.fori_loop(..., unroll=2..4) to keep vreg pressure flat.
    for t in range(T):
        xpt = xproj[t * BP:(t + 1) * BP, :]       # (BP, 4H): one sublane-aligned vreg
        # Accumulator-first form: MXU result accumulated onto the resident
        # xproj slice (lets v7x use the MRB in-place accumulate).
        gates = jnp.dot(h, whh, preferred_element_type=jnp.float32) + xpt

        # Two full-tile EUP pushes, then cheap per-gate lane slices (XLU slot).
        sg = jax.nn.sigmoid(gates)
        tg = jnp.tanh(gates)
        i_g = sg[:, 0 * H:1 * H]
        f_g = sg[:, 1 * H:2 * H]
        g_g = tg[:, 2 * H:3 * H]
        o_g = sg[:, 3 * H:4 * H]

        c = f_g * c + i_g * g_g
        h = o_g * jnp.tanh(c)

    # Dense + row-wise log_softmax on the last hidden state only (valid rows :B).
    y = jnp.dot(h, wd_ref[...], preferred_element_type=jnp.float32) + bd_ref[...]
    m = jnp.max(y, axis=-1, keepdims=True)
    s = y - m
    lse = jnp.log(jnp.sum(jnp.exp(s), axis=-1, keepdims=True))
    out_ref[...] = (s - lse)[:B, :].astype(out_ref.dtype)


# --------------------------- One-time param prep ---------------------------- #

def prepare_params(params):
    """Hoisted weight preprocessing: done ONCE, not on the forward path."""
    emb = params["embedding"]                      # (V, E)
    w_ih = params["w_ih"]                          # (4H, E)
    w_hh = params["w_hh"]                          # (4H, H)
    b = params["b_ih"] + params["b_hh"]            # (4H,)
    w_d = params["w_dense"]                        # (L, H)
    b_d = params["b_dense"]                        # (L,)

    V, _ = emb.shape
    Vp = ((V + 7) // 8) * 8                        # pad vocab to sublane quantum

    # Embedding -> Linear is a linear composition: fold into one (V, 4H) table.
    emb_proj = emb @ w_ih.T + b                    # (V, 4H)
    emb_proj = jnp.pad(emb_proj, ((0, Vp - V), (0, 0)))

    return {
        "emb_proj": emb_proj,                      # (Vp, 4H)
        "whh_t": jnp.transpose(w_hh),              # (H, 4H)
        "wd_t": jnp.transpose(w_d),                # (H, L)
        "bd": b_d.reshape(1, -1),                  # (1, L)
    }


# ------------------------------ Host wrapper -------------------------------- #

def lstm_sentiment_forward(sentence, prep):
    """sentence: (B, T) int32 token ids. Returns (B, 3) log-probs, matching
    F.log_softmax(dense(lstm_out.view(-1,H)), 1).view(B,-1)[:, -3:]."""
    emb_proj = prep["emb_proj"]                    # (Vp, 4H)
    whh_t = prep["whh_t"]                          # (H, 4H)
    wd_t = prep["wd_t"]                            # (H, L)
    bd = prep["bd"]                                # (1, L)

    B, T = sentence.shape
    Vp, G4 = emb_proj.shape
    H = whh_t.shape[0]
    L = wd_t.shape[1]
    # With L == 3, view(B, T*L)[:, -3:] is exactly the last timestep's row of
    # log_softmax — which is what the fused kernel computes.
    assert L == 3, "fast path assumes label_size == 3 (last-3 == last timestep)"

    BP = ((B + 7) // 8) * 8                        # pad batch to 8-sublane vreg

    # Tiny int32 id relayout (time-major, batch padded). Fuses under jit.
    ids_tm = jnp.transpose(sentence.astype(jnp.int32))          # (T, B)
    ids_tm = jnp.pad(ids_tm, ((0, 0), (0, BP - B)))             # (T, BP)
    ids_flat = ids_tm.reshape(T * BP, 1)                        # (T*BP, 1)

    # TODO(synk): for realistic batch sizes, add a batch grid axis tiled ~256
    # rows marked "parallel" (v7x megacore) and set vmem_limit_bytes for the
    # 64 MiB (v7x) / 16 MiB-default (v5e) VMEM budgets.  At these shapes the
    # whole problem is < 100 KB of VMEM, so grid=(1,) is optimal.
    out = pl.pallas_call(
        partial(fused_lstm_sentiment_kernel, B=B, BP=BP, T=T),
        out_shape=jax.ShapeDtypeStruct((B, L), jnp.float32),
        grid=(1,),
        in_specs=[
            pl.BlockSpec((T * BP, 1), lambda i: (0, 0)),
            pl.BlockSpec((Vp, G4), lambda i: (0, 0)),
            pl.BlockSpec((H, G4), lambda i: (0, 0)),
            pl.BlockSpec((H, L), lambda i: (0, 0)),
            pl.BlockSpec((1, L), lambda i: (0, 0)),
        ],
        out_specs=pl.BlockSpec((B, L), lambda i: (0, 0)),
        compiler_params=pltpu.CompilerParams(
            dimension_semantics=("arbitrary",)),
    )(ids_flat, emb_proj, whh_t, wd_t, bd)                      # (B, L)

    return out


# ------------------------------ Reference (JAX) ----------------------------- #

def reference_forward(sentence, params):
    emb = params["embedding"]
    w_ih, w_hh = params["w_ih"], params["w_hh"]
    b_ih, b_hh = params["b_ih"], params["b_hh"]
    w_d, b_d = params["w_dense"], params["b_dense"]
    B, T = sentence.shape
    H = w_hh.shape[1]
    x = jnp.take(emb, sentence, axis=0)                  # (B, T, E)

    def step(carry, x_t):
        h, c = carry
        gates = x_t @ w_ih.T + h @ w_hh.T + b_ih + b_hh
        i = jax.nn.sigmoid(gates[:, 0 * H:1 * H])
        f = jax.nn.sigmoid(gates[:, 1 * H:2 * H])
        g = jnp.tanh(gates[:, 2 * H:3 * H])
        o = jax.nn.sigmoid(gates[:, 3 * H:4 * H])
        c = f * c + i * g
        h = o * jnp.tanh(c)
        return (h, c), h

    h0 = jnp.zeros((B, H), jnp.float32)
    (_, _), hs = jax.lax.scan(step, (h0, h0), jnp.transpose(x, (1, 0, 2)))
    lstm_out = jnp.transpose(hs, (1, 0, 2)).reshape(B * T, H)
    y = lstm_out @ w_d.T + b_d
    y = y - jax.scipy.special.logsumexp(y, axis=1, keepdims=True)
    return y.reshape(B, -1)[:, -3:]


# ----------------------------------- Main ----------------------------------- #

if __name__ == "__main__":
    # Small shapes consistent with the module: 3-class sentiment model.
    batch_size = 2
    seq_len = 8
    embedding_dim = 16
    hidden_dim = 32
    vocab_size = 50
    label_size = 3

    key = jax.random.PRNGKey(0)
    keys = jax.random.split(key, 8)
    scale = 0.1
    params = {
        "embedding": scale * jax.random.normal(keys[0], (vocab_size, embedding_dim), jnp.float32),
        "w_ih": scale * jax.random.normal(keys[1], (4 * hidden_dim, embedding_dim), jnp.float32),
        "w_hh": scale * jax.random.normal(keys[2], (4 * hidden_dim, hidden_dim), jnp.float32),
        "b_ih": scale * jax.random.normal(keys[3], (4 * hidden_dim,), jnp.float32),
        "b_hh": scale * jax.random.normal(keys[4], (4 * hidden_dim,), jnp.float32),
        "w_dense": scale * jax.random.normal(keys[5], (label_size, hidden_dim), jnp.float32),
        "b_dense": scale * jax.random.normal(keys[6], (label_size,), jnp.float32),
    }

    sentence = jax.random.randint(keys[7], (batch_size, seq_len), 0, vocab_size, jnp.int32)

    # One-time (hoisted) weight preprocessing, then jitted forward.
    prep = jax.tree_util.tree_map(jax.block_until_ready, prepare_params(params))
    forward = jax.jit(lstm_sentiment_forward)

    out = forward(sentence, prep)
    out = jax.block_until_ready(out)

    ref = jax.block_until_ready(reference_forward(sentence, params))
    assert out.shape == (batch_size, 3), out.shape
    assert jnp.allclose(out, ref, atol=1e-4, rtol=1e-4), (out, ref)

    print("KERNEL_OK")
</pallas_src>

<mosaic_0001>
module attributes {stable_mosaic.version = 11 : i64} {
  func.func @fused_lstm_sentiment_kernel(%arg0: i32, %arg1: memref<64x1xi32, #tpu.memory_space<vmem>>, %arg2: memref<56x128xf32, #tpu.memory_space<vmem>>, %arg3: memref<32x128xf32, #tpu.memory_space<vmem>>, %arg4: memref<32x3xf32, #tpu.memory_space<vmem>>, %arg5: memref<1x3xf32, #tpu.memory_space<vmem>>, %arg6: memref<2x3xf32, #tpu.memory_space<vmem>>) attributes {dimension_semantics = [#tpu.dimension_semantics<arbitrary>], iteration_bounds = array<i64: 1>, scalar_prefetch = 0 : i64, scratch_operands = 0 : i64, tpu.core_type = #tpu.core_type<tc>, window_params = [{pipeline_mode = #tpu.pipeline_mode<synchronous>, transform_indices = @transform_0, window_bounds = array<i64: 64, 1>}, {pipeline_mode = #tpu.pipeline_mode<synchronous>, transform_indices = @transform_1, window_bounds = array<i64: 56, 128>}, {pipeline_mode = #tpu.pipeline_mode<synchronous>, transform_indices = @transform_2, window_bounds = array<i64: 32, 128>}, {pipeline_mode = #tpu.pipeline_mode<synchronous>, transform_indices = @transform_3, window_bounds = array<i64: 32, 3>}, {pipeline_mode = #tpu.pipeline_mode<synchronous>, transform_indices = @transform_4, window_bounds = array<i64: 1, 3>}, {pipeline_mode = #tpu.pipeline_mode<synchronous>, transform_indices = @transform_5, window_bounds = array<i64: 2, 3>}]} {
    %c0 = arith.constant 0 : index
    %c0_0 = arith.constant 0 : index
    %0 = vector.load %arg1[%c0, %c0_0] : memref<64x1xi32, #tpu.memory_space<vmem>>, vector<64x1xi32>
    %1 = tpu.iota {dimensions = array<i32: 1>} : vector<64x56xi32>
    %2 = vector.broadcast %0 : vector<64x1xi32> to vector<64x56xi32>
    %3 = arith.cmpi eq, %1, %2 : vector<64x56xi32>
    %cst = arith.constant 1.000000e+00 : f32
    %cst_1 = arith.constant 0.000000e+00 : f32
    %4 = vector.broadcast %cst : f32 to vector<64x56xf32>
    %5 = vector.broadcast %cst_1 : f32 to vector<64x56xf32>
    %6 = arith.select %3, %4, %5 : vector<64x56xi1>, vector<64x56xf32>
    %c0_2 = arith.constant 0 : index
    %c0_3 = arith.constant 0 : index
    %7 = vector.load %arg2[%c0_2, %c0_3] : memref<56x128xf32, #tpu.memory_space<vmem>>, vector<56x128xf32>
    %cst_4 = arith.constant dense<0.000000e+00> : vector<64x128xf32>
    %8 = tpu.matmul %6, %7, %cst_4 {dimension_numbers = #tpu.dot_dimension_numbers<[1], [0], [0], [1], [0, 0, 1, 1], [], []>} : vector<64x56xf32>, vector<56x128xf32>, vector<64x128xf32> -> vector<64x128xf32>
    %c0_5 = arith.constant 0 : index
    %c0_6 = arith.constant 0 : index
    %9 = vector.load %arg3[%c0_5, %c0_6] : memref<32x128xf32, #tpu.memory_space<vmem>>, vector<32x128xf32>
    %cst_7 = arith.constant 0.000000e+00 : f32
    %10 = vector.broadcast %cst_7 : f32 to vector<8x32xf32>
    %cst_8 = arith.constant 0.000000e+00 : f32
    %11 = vector.broadcast %cst_8 : f32 to vector<8x32xf32>
    %12 = vector.extract_strided_slice %8 {offsets = [0, 0], sizes = [8, 128], strides = [1, 1]} : vector<64x128xf32> to vector<8x128xf32>
    %cst_9 = arith.constant dense<0.000000e+00> : vector<8x128xf32>
    %13 = tpu.matmul %10, %9, %cst_9 {dimension_numbers = #tpu.dot_dimension_numbers<[1], [0], [0], [1], [0, 0, 1, 1], [], []>} : vector<8x32xf32>, vector<32x128xf32>, vector<8x128xf32> -> vector<8x128xf32>
    %14 = arith.addf %13, %12 : vector<8x128xf32>
    %15 = arith.negf %14 : vector<8x128xf32>
    %16 = math.exp %15 : vector<8x128xf32>
    %cst_10 = arith.constant 1.000000e+00 : f32
    %17 = vector.broadcast %cst_10 : f32 to vector<8x128xf32>
    %18 = arith.addf %17, %16 : vector<8x128xf32>
    %19 = arith.divf %17, %18 : vector<8x128xf32>
    %20 = math.tanh %14 : vector<8x128xf32>
    %21 = vector.extract_strided_slice %19 {offsets = [0, 0], sizes = [8, 32], strides = [1, 1]} : vector<8x128xf32> to vector<8x32xf32>
    %22 = vector.extract_strided_slice %19 {offsets = [0, 32], sizes = [8, 32], strides = [1, 1]} : vector<8x128xf32> to vector<8x32xf32>
    %23 = vector.extract_strided_slice %20 {offsets = [0, 64], sizes = [8, 32], strides = [1, 1]} : vector<8x128xf32> to vector<8x32xf32>
    %24 = vector.extract_strided_slice %19 {offsets = [0, 96], sizes = [8, 32], strides = [1, 1]} : vector<8x128xf32> to vector<8x32xf32>
    %25 = arith.mulf %22, %11 : vector<8x32xf32>
    %26 = arith.mulf %21, %23 : vector<8x32xf32>
    %27 = arith.addf %25, %26 : vector<8x32xf32>
    %28 = math.tanh %27 : vector<8x32xf32>
    %29 = arith.mulf %24, %28 : vector<8x32xf32>
    %30 = vector.extract_strided_slice %8 {offsets = [8, 0], sizes = [8, 128], strides = [1, 1]} : vector<64x128xf32> to vector<8x128xf32>
    %cst_11 = arith.constant dense<0.000000e+00> : vector<8x128xf32>
    %31 = tpu.matmul %29, %9, %cst_11 {dimension_numbers = #tpu.dot_dimension_numbers<[1], [0], [0], [1], [0, 0, 1, 1], [], []>} : vector<8x32xf32>, vector<32x128xf32>, vector<8x128xf32> -> vector<8x128xf32>
    %32 = arith.addf %31, %30 : vector<8x128xf32>
    %33 = arith.negf %32 : vector<8x128xf32>
    %34 = math.exp %33 : vector<8x128xf32>
    %cst_12 = arith.constant 1.000000e+00 : f32
    %35 = vector.broadcast %cst_12 : f32 to vector<8x128xf32>
    %36 = arith.addf %35, %34 : vector<8x128xf32>
    %37 = arith.divf %35, %36 : vector<8x128xf32>
    %38 = math.tanh %32 : vector<8x128xf32>
    %39 = vector.extract_strided_slice %37 {offsets = [0, 0], sizes = [8, 32], strides = [1, 1]} : vector<8x128xf32> to vector<8x32xf32>
    %40 = vector.extract_strided_slice %37 {offsets = [0, 32], sizes = [8, 32], strides = [1, 1]} : vector<8x128xf32> to vector<8x32xf32>
    %41 = vector.extract_strided_slice %38 {offsets = [0, 64], sizes = [8, 32], strides = [1, 1]} : vector<8x128xf32> to vector<8x32xf32>
    %42 = vector.extract_strided_slice %37 {offsets = [0, 96], sizes = [8, 32], strides = [1, 1]} : vector<8x128xf32> to vector<8x32xf32>
    %43 = arith.mulf %40, %27 : vector<8x32xf32>
    %44 = arith.mulf %39, %41 : vector<8x32xf32>
    %45 = arith.addf %43, %44 : vector<8x32xf32>
    %46 = math.tanh %45 : vector<8x32xf32>
    %47 = arith.mulf %42, %46 : vector<8x32xf32>
    %48 = vector.extract_strided_slice %8 {offsets = [16, 0], sizes = [8, 128], strides = [1, 1]} : vector<64x128xf32> to vector<8x128xf32>
    %cst_13 = arith.constant dense<0.000000e+00> : vector<8x128xf32>
    %49 = tpu.matmul %47, %9, %cst_13 {dimension_numbers = #tpu.dot_dimension_numbers<[1], [0], [0], [1], [0, 0, 1, 1], [], []>} : vector<8x32xf32>, vector<32x128xf32>, vector<8x128xf32> -> vector<8x128xf32>
    %50 = arith.addf %49, %48 : vector<8x128xf32>
    %51 = arith.negf %50 : vector<8x128xf32>
    %52 = math.exp %51 : vector<8x128xf32>
    %cst_14 = arith.constant 1.000000e+00 : f32
    %53 = vector.broadcast %cst_14 : f32 to vector<8x128xf32>
    %54 = arith.addf %53, %52 : vector<8x128xf32>
    %55 = arith.divf %53, %54 : vector<8x128xf32>
    %56 = math.tanh %50 : vector<8x128xf32>
    %57 = vector.extract_strided_slice %55 {offsets = [0, 0], sizes = [8, 32], strides = [1, 1]} : vector<8x128xf32> to vector<8x32xf32>
    %58 = vector.extract_strided_slice %55 {offsets = [0, 32], sizes = [8, 32], strides = [1, 1]} : vector<8x128xf32> to vector<8x32xf32>
    %59 = vector.extract_strided_slice %56 {offsets = [0, 64], sizes = [8, 32], strides = [1, 1]} : vector<8x128xf32> to vector<8x32xf32>
    %60 = vector.extract_strided_slice %55 {offsets = [0, 96], sizes = [8, 32], strides = [1, 1]} : vector<8x128xf32> to vector<8x32xf32>
    %61 = arith.mulf %58, %45 : vector<8x32xf32>
    %62 = arith.mulf %57, %59 : vector<8x32xf32>
    %63 = arith.addf %61, %62 : vector<8x32xf32>
    %64 = math.tanh %63 : vector<8x32xf32>
    %65 = arith.mulf %60, %64 : vector<8x32xf32>
    %66 = vector.extract_strided_slice %8 {offsets = [24, 0], sizes = [8, 128], strides = [1, 1]} : vector<64x128xf32> to vector<8x128xf32>
    %cst_15 = arith.constant dense<0.000000e+00> : vector<8x128xf32>
    %67 = tpu.matmul %65, %9, %cst_15 {dimension_numbers = #tpu.dot_dimension_numbers<[1], [0], [0], [1], [0, 0, 1, 1], [], []>} : vector<8x32xf32>, vector<32x128xf32>, vector<8x128xf32> -> vector<8x128xf32>
    %68 = arith.addf %67, %66 : vector<8x128xf32>
    %69 = arith.negf %68 : vector<8x128xf32>
    %70 = math.exp %69 : vector<8x128xf32>
    %cst_16 = arith.constant 1.000000e+00 : f32
    %71 = vector.broadcast %cst_16 : f32 to vector<8x128xf32>
    %72 = arith.addf %71, %70 : vector<8x128xf32>
    %73 = arith.divf %71, %72 : vector<8x128xf32>
    %74 = math.tanh %68 : vector<8x128xf32>
    %75 = vector.extract_strided_slice %73 {offsets = [0, 0], sizes = [8, 32], strides = [1, 1]} : vector<8x128xf32> to vector<8x32xf32>
    %76 = vector.extract_strided_slice %73 {offsets = [0, 32], sizes = [8, 32], strides = [1, 1]} : vector<8x128xf32> to vector<8x32xf32>
    %77 = vector.extract_strided_slice %74 {offsets = [0, 64], sizes = [8, 32], strides = [1, 1]} : vector<8x128xf32> to vector<8x32xf32>
    %78 = vector.extract_strided_slice %73 {offsets = [0, 96], sizes = [8, 32], strides = [1, 1]} : vector<8x128xf32> to vector<8x32xf32>
    %79 = arith.mulf %76, %63 : vector<8x32xf32>
    %80 = arith.mulf %75, %77 : vector<8x32xf32>
    %81 = arith.addf %79, %80 : vector<8x32xf32>
    %82 = math.tanh %81 : vector<8x32xf32>
    %83 = arith.mulf %78, %82 : vector<8x32xf32>
    %84 = vector.extract_strided_slice %8 {offsets = [32, 0], sizes = [8, 128], strides = [1, 1]} : vector<64x128xf32> to vector<8x128xf32>
    %cst_17 = arith.constant dense<0.000000e+00> : vector<8x128xf32>
    %85 = tpu.matmul %83, %9, %cst_17 {dimension_numbers = #tpu.dot_dimension_numbers<[1], [0], [0], [1], [0, 0, 1, 1], [], []>} : vector<8x32xf32>, vector<32x128xf32>, vector<8x128xf32> -> vector<8x128xf32>
    %86 = arith.addf %85, %84 : vector<8x128xf32>
    %87 = arith.negf %86 : vector<8x128xf32>
    %88 = math.exp %87 : vector<8x128xf32>
    %cst_18 = arith.constant 1.000000e+00 : f32
    %89 = vector.broadcast %cst_18 : f32 to vector<8x128xf32>
    %90 = arith.addf %89, %88 : vector<8x128xf32>
    %91 = arith.divf %89, %90 : vector<8x128xf32>
    %92 = math.tanh %86 : vector<8x128xf32>
    %93 = vector.extract_strided_slice %91 {offsets = [0, 0], sizes = [8, 32], strides = [1, 1]} : vector<8x128xf32> to vector<8x32xf32>
    %94 = vector.extract_strided_slice %91 {offsets = [0, 32], sizes = [8, 32], strides = [1, 1]} : vector<8x128xf32> to vector<8x32xf32>
    %95 = vector.extract_strided_slice %92 {offsets = [0, 64], sizes = [8, 32], strides = [1, 1]} : vector<8x128xf32> to vector<8x32xf32>
    %96 = vector.extract_strided_slice %91 {offsets = [0, 96], sizes = [8, 32], strides = [1, 1]} : vector<8x128xf32> to vector<8x32xf32>
    %97 = arith.mulf %94, %81 : vector<8x32xf32>
    %98 = arith.mulf %93, %95 : vector<8x32xf32>
    %99 = arith.addf %97, %98 : vector<8x32xf32>
    %100 = math.tanh %99 : vector<8x32xf32>
    %101 = arith.mulf %96, %100 : vector<8x32xf32>
    %102 = vector.extract_strided_slice %8 {offsets = [40, 0], sizes = [8, 128], strides = [1, 1]} : vector<64x128xf32> to vector<8x128xf32>
    %cst_19 = arith.constant dense<0.000000e+00> : vector<8x128xf32>
    %103 = tpu.matmul %101, %9, %cst_19 {dimension_numbers = #tpu.dot_dimension_numbers<[1], [0], [0], [1], [0, 0, 1, 1], [], []>} : vector<8x32xf32>, vector<32x128xf32>, vector<8x128xf32> -> vector<8x128xf32>
    %104 = arith.addf %103, %102 : vector<8x128xf32>
    %105 = arith.negf %104 : vector<8x128xf32>
    %106 = math.exp %105 : vector<8x128xf32>
    %cst_20 = arith.constant 1.000000e+00 : f32
    %107 = vector.broadcast %cst_20 : f32 to vector<8x128xf32>
    %108 = arith.addf %107, %106 : vector<8x128xf32>
    %109 = arith.divf %107, %108 : vector<8x128xf32>
    %110 = math.tanh %104 : vector<8x128xf32>
    %111 = vector.extract_strided_slice %109 {offsets = [0, 0], sizes = [8, 32], strides = [1, 1]} : vector<8x128xf32> to vector<8x32xf32>
    %112 = vector.extract_strided_slice %109 {offsets = [0, 32], sizes = [8, 32], strides = [1, 1]} : vector<8x128xf32> to vector<8x32xf32>
    %113 = vector.extract_strided_slice %110 {offsets = [0, 64], sizes = [8, 32], strides = [1, 1]} : vector<8x128xf32> to vector<8x32xf32>
    %114 = vector.extract_strided_slice %109 {offsets = [0, 96], sizes = [8, 32], strides = [1, 1]} : vector<8x128xf32> to vector<8x32xf32>
    %115 = arith.mulf %112, %99 : vector<8x32xf32>
    %116 = arith.mulf %111, %113 : vector<8x32xf32>
    %117 = arith.addf %115, %116 : vector<8x32xf32>
    %118 = math.tanh %117 : vector<8x32xf32>
    %119 = arith.mulf %114, %118 : vector<8x32xf32>
    %120 = vector.extract_strided_slice %8 {offsets = [48, 0], sizes = [8, 128], strides = [1, 1]} : vector<64x128xf32> to vector<8x128xf32>
    %cst_21 = arith.constant dense<0.000000e+00> : vector<8x128xf32>
    %121 = tpu.matmul %119, %9, %cst_21 {dimension_numbers = #tpu.dot_dimension_numbers<[1], [0], [0], [1], [0, 0, 1, 1], [], []>} : vector<8x32xf32>, vector<32x128xf32>, vector<8x128xf32> -> vector<8x128xf32>
    %122 = arith.addf %121, %120 : vector<8x128xf32>
    %123 = arith.negf %122 : vector<8x128xf32>
    %124 = math.exp %123 : vector<8x128xf32>
    %cst_22 = arith.constant 1.000000e+00 : f32
    %125 = vector.broadcast %cst_22 : f32 to vector<8x128xf32>
    %126 = arith.addf %125, %124 : vector<8x128xf32>
    %127 = arith.divf %125, %126 : vector<8x128xf32>
    %128 = math.tanh %122 : vector<8x128xf32>
    %129 = vector.extract_strided_slice %127 {offsets = [0, 0], sizes = [8, 32], strides = [1, 1]} : vector<8x128xf32> to vector<8x32xf32>
    %130 = vector.extract_strided_slice %127 {offsets = [0, 32], sizes = [8, 32], strides = [1, 1]} : vector<8x128xf32> to vector<8x32xf32>
    %131 = vector.extract_strided_slice %128 {offsets = [0, 64], sizes = [8, 32], strides = [1, 1]} : vector<8x128xf32> to vector<8x32xf32>
    %132 = vector.extract_strided_slice %127 {offsets = [0, 96], sizes = [8, 32], strides = [1, 1]} : vector<8x128xf32> to vector<8x32xf32>
    %133 = arith.mulf %130, %117 : vector<8x32xf32>
    %134 = arith.mulf %129, %131 : vector<8x32xf32>
    %135 = arith.addf %133, %134 : vector<8x32xf32>
    %136 = math.tanh %135 : vector<8x32xf32>
    %137 = arith.mulf %132, %136 : vector<8x32xf32>
    %138 = vector.extract_strided_slice %8 {offsets = [56, 0], sizes = [8, 128], strides = [1, 1]} : vector<64x128xf32> to vector<8x128xf32>
    %cst_23 = arith.constant dense<0.000000e+00> : vector<8x128xf32>
    %139 = tpu.matmul %137, %9, %cst_23 {dimension_numbers = #tpu.dot_dimension_numbers<[1], [0], [0], [1], [0, 0, 1, 1], [], []>} : vector<8x32xf32>, vector<32x128xf32>, vector<8x128xf32> -> vector<8x128xf32>
    %140 = arith.addf %139, %138 : vector<8x128xf32>
    %141 = arith.negf %140 : vector<8x128xf32>
    %142 = math.exp %141 : vector<8x128xf32>
    %cst_24 = arith.constant 1.000000e+00 : f32
    %143 = vector.broadcast %cst_24 : f32 to vector<8x128xf32>
    %144 = arith.addf %143, %142 : vector<8x128xf32>
    %145 = arith.divf %143, %144 : vector<8x128xf32>
    %146 = math.tanh %140 : vector<8x128xf32>
    %147 = vector.extract_strided_slice %145 {offsets = [0, 0], sizes = [8, 32], strides = [1, 1]} : vector<8x128xf32> to vector<8x32xf32>
    %148 = vector.extract_strided_slice %145 {offsets = [0, 32], sizes = [8, 32], strides = [1, 1]} : vector<8x128xf32> to vector<8x32xf32>
    %149 = vector.extract_strided_slice %146 {offsets = [0, 64], sizes = [8, 32], strides = [1, 1]} : vector<8x128xf32> to vector<8x32xf32>
    %150 = vector.extract_strided_slice %145 {offsets = [0, 96], sizes = [8, 32], strides = [1, 1]} : vector<8x128xf32> to vector<8x32xf32>
    %151 = arith.mulf %148, %135 : vector<8x32xf32>
    %152 = arith.mulf %147, %149 : vector<8x32xf32>
    %153 = arith.addf %151, %152 : vector<8x32xf32>
    %154 = math.tanh %153 : vector<8x32xf32>
    %155 = arith.mulf %150, %154 : vector<8x32xf32>
    %c0_25 = arith.constant 0 : index
    %c0_26 = arith.constant 0 : index
    %156 = vector.load %arg4[%c0_25, %c0_26] : memref<32x3xf32, #tpu.memory_space<vmem>>, vector<32x3xf32>
    %cst_27 = arith.constant dense<0.000000e+00> : vector<8x3xf32>
    %157 = tpu.matmul %155, %156, %cst_27 {dimension_numbers = #tpu.dot_dimension_numbers<[1], [0], [0], [1], [0, 0, 1, 1], [], []>} : vector<8x32xf32>, vector<32x3xf32>, vector<8x3xf32> -> vector<8x3xf32>
    %c0_28 = arith.constant 0 : index
    %c0_29 = arith.constant 0 : index
    %158 = vector.load %arg5[%c0_28, %c0_29] : memref<1x3xf32, #tpu.memory_space<vmem>>, vector<1x3xf32>
    %159 = vector.broadcast %158 : vector<1x3xf32> to vector<8x3xf32>
    %160 = arith.addf %157, %159 : vector<8x3xf32>
    %cst_30 = arith.constant dense<0xFF800000> : vector<8xf32>
    %161 = vector.multi_reduction <maximumf>, %160, %cst_30 [1] : vector<8x3xf32> to vector<8xf32>
    %162 = vector.shape_cast %161 : vector<8xf32> to vector<8x1xf32>
    %163 = vector.broadcast %162 : vector<8x1xf32> to vector<8x3xf32>
    %164 = arith.subf %160, %163 : vector<8x3xf32>
    %165 = math.exp %164 : vector<8x3xf32>
    %cst_31 = arith.constant dense<0.000000e+00> : vector<8xf32>
    %166 = vector.multi_reduction <add>, %165, %cst_31 [1] : vector<8x3xf32> to vector<8xf32>
    %167 = vector.shape_cast %166 : vector<8xf32> to vector<8x1xf32>
    %168 = math.log %167 : vector<8x1xf32>
    %169 = vector.broadcast %168 : vector<8x1xf32> to vector<8x3xf32>
    %170 = arith.subf %164, %169 : vector<8x3xf32>
    %171 = vector.extract_strided_slice %170 {offsets = [0, 0], sizes = [2, 3], strides = [1, 1]} : vector<8x3xf32> to vector<2x3xf32>
    %c0_32 = arith.constant 0 : index
    %c0_33 = arith.constant 0 : index
    %172 = vector.load %arg6[%c0_32, %c0_33] : memref<2x3xf32, #tpu.memory_space<vmem>>, vector<2x3xf32>
    tpu.vector_store %arg6[%c0_32, %c0_33], %171 {strides = array<i32>} : memref<2x3xf32, #tpu.memory_space<vmem>>, vector<2x3xf32>,
    return
  }
  func.func @transform_0(%arg0: i32) -> (i32, i32) {
    %c0_i32 = arith.constant 0 : i32
    %c0_i32_0 = arith.constant 0 : i32
    %c0_i32_1 = arith.constant 0 : i32
    return %c0_i32, %c0_i32_0 : i32, i32
  }
  func.func @transform_1(%arg0: i32) -> (i32, i32) {
    %c0_i32 = arith.constant 0 : i32
    %c0_i32_0 = arith.constant 0 : i32
    %c0_i32_1 = arith.constant 0 : i32
    return %c0_i32, %c0_i32_0 : i32, i32
  }
  func.func @transform_2(%arg0: i32) -> (i32, i32) {
    %c0_i32 = arith.constant 0 : i32
    %c0_i32_0 = arith.constant 0 : i32
    %c0_i32_1 = arith.constant 0 : i32
    return %c0_i32, %c0_i32_0 : i32, i32
  }
  func.func @transform_3(%arg0: i32) -> (i32, i32) {
    %c0_i32 = arith.constant 0 : i32
    %c0_i32_0 = arith.constant 0 : i32
    %c0_i32_1 = arith.constant 0 : i32
    return %c0_i32, %c0_i32_0 : i32, i32
  }
  func.func @transform_4(%arg0: i32) -> (i32, i32) {
    %c0_i32 = arith.constant 0 : i32
    %c0_i32_0 = arith.constant 0 : i32
    %c0_i32_1 = arith.constant 0 : i32
    return %c0_i32, %c0_i32_0 : i32, i32
  }
  func.func @transform_5(%arg0: i32) -> (i32, i32) {
    %c0_i32 = arith.constant 0 : i32
    %c0_i32_0 = arith.constant 0 : i32
    %c0_i32_1 = arith.constant 0 : i32
    return %c0_i32, %c0_i32_0 : i32, i32
  }
}

</mosaic_0001>

<bundles_post_ra>
// kernel: lstm_sentiment_forward.1
= control target key start
LH: loop header
LB: loop body
LE: loop exit
PB: predicated region body
PF: predicated region fallthrough
CT: control target
= control target key end

     0   :  { %v1495_v2 = vmov 0   ;;  %v1496_v7 = vmov 0.0|0.0   ;;  %s1751_s0 = inlined_call_operand.vmem [shape: s32[64,1], index: 0, kind: input, shape index: {}]   ;;  %s1752_s1 = inlined_call_operand.vmem [shape: f32[56,128], index: 1, kind: input, shape index: {}]   ;;  %s1753_s2 = inlined_call_operand.vmem [shape: f32[32,128], index: 2, kind: input, shape index: {}]   ;;  %s1754_s3 = inlined_call_operand.vmem [shape: f32[32,3], index: 3, kind: input, shape index: {}]   ;;  %s1755_s4 = inlined_call_operand.vmem [shape: f32[1,3], index: 4, kind: input, shape index: {}]   ;;  %s1756_s5 = inlined_call_operand.hbm [shape: f32[2,3], index: 5, kind: output, shape index: {}]  }
   0x1   :  { %v21_v0 = vld [vmem:[%s1751_s0] sm:$0xff]  ;;  %1401 = vset.pattern.permute.xlu0 %v1495_v2  ;;  %v22_v3 = vld [vmem:[%s1751_s0 + $0x8] sm:$0xff]  ;;  %v73_v5 = vld [vmem:[%s1752_s1 + $0x10] sm:$0xff]  ;;  %1340 = vmatprep.subr.bf16.mxu1 %v1496_v7 }
   0x2   :  { %v71_v1 = vld [vmem:[%s1752_s1] sm:$0xff]  ;;  %v72_v4 = vld [vmem:[%s1752_s1 + $0x8] sm:$0xff]  ;;  %v74_v6 = vld [vmem:[%s1752_s1 + $0x18] sm:$0xff]  ;;  %32 = vperm.xlu0 %1401, %v21_v0   ;;  %1402 = vset.pattern.permute.xlu1 %v1495_v2 }
   0x3   :  { %v1328_v8 = vpack.c.bf16 %v72_v4, %v71_v1  ;;  %v1332_v9 = vpack.c.bf16 %v74_v6, %v73_v5  ;;  %v208_v10 = vld [vmem:[%s1753_s2] sm:$0xff]  ;;  %v209_v11 = vld [vmem:[%s1753_s2 + $0x8] sm:$0xff]  ;;  %v210_v15 = vld [vmem:[%s1753_s2 + $0x10] sm:$0xff] }
   0x4   :  { %v75_v12 = vld [vmem:[%s1752_s1 + $0x20] sm:$0xff]  ;;  %v1560_v13 = vpack.c.bf16 %v209_v11, %v208_v10  ;;  %v76_v14 = vld [vmem:[%s1752_s1 + $0x28] sm:$0xff]  ;;  %v211_v16 = vld [vmem:[%s1753_s2 + $0x18] sm:$0xff] }
   0x5   :  { %1329 = vmatprep.subr.bf16.mxu0 %v1328_v8 }
   0x6   :  { %10 = vsyncpa [#allocation3], 0  ;;  %1331 = vmatpush3.bf16.msra.mxu0 %v1328_v8  ;;  %1342 = vmatpush3.bf16.msra.mxu1 %v1560_v13  ;;  %v1572_v17 = vpack.c.bf16 %v211_v16, %v210_v15  ;;  %v1336_v18 = vpack.c.bf16 %v76_v14, %v75_v12  ;;  %vm1497_vm0 = vmmov 0   ;;  %v1498_v19 = vmov 0.0   ;;  %v77_v20 = vld [vmem:[%s1752_s1 + $0x30] sm:$0xff]  ;;  %s1499_s1 = smov 64  }
   0x7   :  { %35 = vperm.xlu0 %1401, %v22_v3   ;;  %1333 = vmatprep.subr.bf16.mxu0 %v1332_v9  ;;  %v29_v21 = vlaneseq  ;;  %vm78_vm1 = vcmask 457728   ;;  %s1500_s18 = smov 32   ;;  %vm212_vm4 = vcmask 261120   ;;  %v23_v56 = vld [vmem:[%s1751_s0 + $0x10] sm:$0xff]  ;;  %v24_v61 = vld [vmem:[%s1751_s0 + $0x18] sm:$0xff]  ;;  %vm1089_vm11 = vcmask 23552  }
   0x8   :  { %1343 = vmatprep.subr.bf16.mxu1 %v1496_v7  ;;  %1237 = vmatprep.mubr.msk.f32.mxu1 %vm1497_vm0, %v1498_v19  ;;  %vm1102_vm12 = vcmask 17408  }
   0x9   :  { %v1590_v22 = vand.u32 127, %v29_v21  ;;  %v25_v21 = vld [vmem:[%s1751_s0 + $0x20] sm:$0xff] }
   0xa   :  { %1335 = vmatpush3.bf16.msra.mxu0 %v1332_v9  ;;  %1345 = vmatpush3.bf16.msra.mxu1 %v1572_v17 }
   0xb   :  { %1337 = vmatprep.subr.bf16.mxu0 %v1336_v18  ;;  %1346 = vmatprep.subr.bf16.mxu1 %v1496_v7 }
   0xd   :  { %1238 = vmatmul.mubr.f32.vlgmr.msra.gmra.mrb[0].mxu1 %v1498_v19 }
   0xe   :  { %1339 = vmatpush3.bf16.msra.mxu0 %v1336_v18  ;;  %1348 = vmatpush3.bf16.msra.mxu1 %v1560_v13 }
   0xf   :  { %1215 = vmatprep.subr.mxu0 %v77_v20  ;;  %1349 = vmatprep.subr.bf16.mxu1 %v1496_v7 }
  0x10   :  { %1248 = vmatprep.mubr.msk.f32.mxu1 %vm1497_vm0, %v1498_v19 }
  0x12   :  { %1216 = vmatpush3.msra.mxu0 %v77_v20  ;;  %1351 = vmatpush3.bf16.msra.mxu1 %v1572_v17 }
  0x13   :  { %1352 = vmatprep.subr.bf16.mxu1 %v1496_v7  ;;  %1358 = vmatprep.subr.bf16.mxu0 %v1496_v7 }
  0x81   :  { %v33_v23 = vpop.permute.xlu0 %32 }
  0x82   :  { %vm55_vm2 = vcmp.eq.s32.totalorder %v1590_v22, %v33_v23  ;;  %v27_v23 = vld [vmem:[%s1751_s0 + $0x30] sm:$0xff] }
  0x83   :  { %v63_v24 = vsel %vm55_vm2, 1.0, %v1498_v19 }
  0x84   :  { %1217 = vmatprep.mubr.msk.f32.mxu0 %vm78_vm1, %v63_v24 }
  0x86   :  { %v36_v25 = vpop.permute.xlu0 %35 }
  0x87   :  { %vm56_vm3 = vcmp.eq.s32.totalorder %v1590_v22, %v36_v25 }
  0x88   :  { %v64_v26 = vsel %vm56_vm3, 1.0, %v1498_v19 }
  0x89   :  { %1218 = vmatmul.mubr.msk.f32.vlgmr.msra.gmra.mrb[0].mxu0 %vm78_vm1, %v64_v26 }
  0x8a   :  { %1360 = vmatpush3.bf16.msra.mxu0 %v1560_v13 }
  0x8b   :  { %1361 = vmatprep.subr.bf16.mxu0 %v1496_v7 }
  0x8e   :  { %1363 = vmatpush3.bf16.msra.mxu0 %v1572_v17 }
  0x8f   :  { %1370 = vmatprep.subr.bf16.mxu0 %v1496_v7 }
  0xe0   :  { %v282_v27 = vpop.f32.mrb[0].mxu1 }
  0xe1   :  { %v1239_v28 = vpop.f32.mrb[1].mxu1 }
  0xe2   :  { %v26_v28 = vld [vmem:[%s1751_s0 + $0x28] sm:$0xff] }
 0x15c   :  { %v1219_v29 = vpop.f32.mrb[0].mxu0 }
 0x15d   :  { %v169_v30 = vpop.f32.mrb[1].mxu0 }
 0x15e   :  { %v283_v31 = vadd.f32 %v282_v27, %v169_v30 }
 0x160   :  { %1403 = vtanh.f32 %v283_v31  ;;  %v1126_v33 = vmul.f32 -1.442695, %v283_v31  ;;  %v28_v31 = vld [vmem:[%s1751_s0 + $0x38] sm:$0xff] }
 0x162   :  { %1405 = vpow2.f32 %v1126_v33 }
 0x16a   :  { %v1404_v32 = vpop.eup %1403 }
 0x16b   :  { %295 = vrot.lane.b32.xlu1 %v1404_v32, %s1499_s1 }
 0x16c   :  { %v1406_v34 = vpop.eup %1405 }
 0x16d   :  { %v289_v35 = vadd.f32 1.0, %v1406_v34 }
 0x16f   :  { %1407 = vrcp.f32 %v289_v35 }
 0x179   :  { %v1408_v36 = vpop.eup %1407 }
 0x17a   :  { %v293_v39 = vmul.f32 0.0, %v1408_v36 }
 0x1dd   :  { %v296_v37 = vpop.permute.xlu1 %295 }
 0x1de   :  { %v298_v38 = vmul.f32 %v1408_v36, %v296_v37 }
 0x1e0   :  { %300 = vrot.lane.b32.xlu1 %v298_v38, %s1500_s18 }
 0x252   :  { %v301_v40 = vpop.permute.xlu1 %300 }
 0x253   :  { %v303_v41 = vadd.f32 %v301_v40, %v293_v39 }
 0x255   :  { %1409 = vtanh.f32 %v303_v41 }
 0x25f   :  { %v1410_v42 = vpop.eup %1409 }
 0x260   :  { %306 = vrot.lane.b32.xlu0 %v1410_v42, %s1499_s1 }
 0x2d2   :  { %v307_v43 = vpop.permute.xlu0 %306 }
 0x2d3   :  { %v309_v44 = vmul.f32 %v1408_v36, %v307_v43 }
 0x2d5   :  { %311 = vrot.lane.b32.xlu1 %v309_v44, %s1500_s18 }
 0x347   :  { %v312_v45 = vpop.permute.xlu1 %311 }
 0x348   :  { %1249 = vmatmul.mubr.msk.f32.vlgmr.msra.gmra.mrb[2].mxu1 %vm212_vm4, %v312_v45 }
 0x349   :  { %1354 = vmatpush3.bf16.msra.mxu1 %v1560_v13  ;;  %1259 = vmatprep.mubr.msk.f32.mxu1 %vm1497_vm0, %v1498_v19 }
 0x34a   :  { %1355 = vmatprep.subr.bf16.mxu1 %v1496_v7 }
 0x34d   :  { %1357 = vmatpush3.bf16.msra.mxu1 %v1572_v17 }
 0x34e   :  { %1364 = vmatprep.subr.bf16.mxu1 %v1496_v7 }
 0x41b   :  { %v381_v46 = vpop.f32.mrb[2].mxu1 }
 0x41c   :  { %v382_v47 = vadd.f32 %v1219_v29, %v381_v46  ;;  %v1250_v48 = vpop.f32.mrb[3].mxu1 }
 0x41e   :  { %1411 = vtanh.f32 %v382_v47  ;;  %v1128_v50 = vmul.f32 -1.442695, %v382_v47 }
 0x420   :  { %1413 = vpow2.f32 %v1128_v50 }
 0x428   :  { %v1412_v49 = vpop.eup %1411 }
 0x429   :  { %394 = vrot.lane.b32.xlu0 %v1412_v49, %s1499_s1 }
 0x42a   :  { %v1414_v51 = vpop.eup %1413 }
 0x42b   :  { %v388_v52 = vadd.f32 1.0, %v1414_v51 }
 0x42d   :  { %1415 = vrcp.f32 %v388_v52 }
 0x437   :  { %v1416_v53 = vpop.eup %1415 }
 0x438   :  { %v392_v57 = vmul.f32 %v1416_v53, %v303_v41 }
 0x49b   :  { %v395_v54 = vpop.permute.xlu0 %394 }
 0x49c   :  { %v397_v55 = vmul.f32 %v1416_v53, %v395_v54 }
 0x49e   :  { %399 = vrot.lane.b32.xlu1 %v397_v55, %s1500_s18 }
 0x4a2   :  { %38 = vperm.xlu1 %1402, %v23_v56  }
 0x510   :  { %v400_v58 = vpop.permute.xlu1 %399 }
 0x511   :  { %v402_v59 = vadd.f32 %v400_v58, %v392_v57 }
 0x513   :  { %1417 = vtanh.f32 %v402_v59 }
 0x51d   :  { %v1418_v60 = vpop.eup %1417 }
 0x51e   :  { %405 = vrot.lane.b32.xlu0 %v1418_v60, %s1499_s1 }
 0x521   :  { %v39_v62 = vpop.permute.xlu1 %38 }
 0x522   :  { %41 = vperm.xlu0 %1401, %v24_v61   ;;  %vm57_vm5 = vcmp.eq.s32.totalorder %v1590_v22, %v39_v62 }
 0x523   :  { %v65_v63 = vsel %vm57_vm5, 1.0, %v1498_v19 }
 0x524   :  { %1220 = vmatprep.mubr.msk.f32.mxu0 %vm78_vm1, %v65_v63 }
 0x590   :  { %v406_v0 = vpop.permute.xlu0 %405 }
 0x591   :  { %v408_v1 = vmul.f32 %v1416_v53, %v406_v0 }
 0x593   :  { %410 = vrot.lane.b32.xlu1 %v408_v1, %s1500_s18 }
 0x5a1   :  { %v42_v2 = vpop.permute.xlu0 %41 }
 0x5a2   :  { %vm58_vm6 = vcmp.eq.s32.totalorder %v1590_v22, %v42_v2 }
 0x5a3   :  { %v66_v3 = vsel %vm58_vm6, 1.0, %v1498_v19 }
 0x5a4   :  { %1221 = vmatmul.mubr.msk.f32.gmra.mrb[2].mxu0 %vm78_vm1, %v66_v3 }
 0x605   :  { %v411_v4 = vpop.permute.xlu1 %410 }
 0x606   :  { %1260 = vmatmul.mubr.msk.f32.vlgmr.msra.gmra.mrb[4].mxu1 %vm212_vm4, %v411_v4 }
 0x607   :  { %1366 = vmatpush3.bf16.msra.mxu1 %v1560_v13  ;;  %1281 = vmatprep.mubr.msk.f32.mxu1 %vm1497_vm0, %v1498_v19 }
 0x608   :  { %1367 = vmatprep.subr.bf16.mxu1 %v1496_v7 }
 0x60b   :  { %1369 = vmatpush3.bf16.msra.mxu1 %v1572_v17 }
 0x60c   :  { %1376 = vmatprep.subr.bf16.mxu1 %v1496_v7 }
 0x677   :  { %v1636_v5 = vpop.f32.mrb[2].mxu0 }
 0x678   :  { %v179_v6 = vpop.f32.mrb[3].mxu0 }
 0x6d9   :  { %v480_v8 = vpop.f32.mrb[4].mxu1 }
 0x6da   :  { %v481_v9 = vadd.f32 %v480_v8, %v179_v6  ;;  %v1261_v10 = vpop.f32.mrb[5].mxu1 }
 0x6dc   :  { %1419 = vtanh.f32 %v481_v9  ;;  %v1130_v12 = vmul.f32 -1.442695, %v481_v9 }
 0x6de   :  { %1421 = vpow2.f32 %v1130_v12 }
 0x6e6   :  { %v1420_v11 = vpop.eup %1419 }
 0x6e7   :  { %493 = vrot.lane.b32.xlu0 %v1420_v11, %s1499_s1 }
 0x6e8   :  { %v1422_v14 = vpop.eup %1421 }
 0x6e9   :  { %v487_v15 = vadd.f32 1.0, %v1422_v14 }
 0x6eb   :  { %1423 = vrcp.f32 %v487_v15 }
 0x6f5   :  { %v1424_v16 = vpop.eup %1423 }
 0x6f6   :  { %v491_v24 = vmul.f32 %v1424_v16, %v402_v59 }
 0x759   :  { %v494_v18 = vpop.permute.xlu0 %493 }
 0x75a   :  { %v496_v20 = vmul.f32 %v1424_v16, %v494_v18 }
 0x75c   :  { %498 = vrot.lane.b32.xlu1 %v496_v20, %s1500_s18 }
 0x760   :  { %44 = vperm.xlu1 %1402, %v25_v21  }
 0x764   :  { %50 = vperm.xlu1 %1402, %v27_v23  }
 0x7ce   :  { %v499_v25 = vpop.permute.xlu1 %498 }
 0x7cf   :  { %v501_v26 = vadd.f32 %v499_v25, %v491_v24 }
 0x7d1   :  { %1425 = vtanh.f32 %v501_v26 }
 0x7db   :  { %v1426_v27 = vpop.eup %1425 }
 0x7dc   :  { %504 = vrot.lane.b32.xlu0 %v1426_v27, %s1499_s1 }
 0x7df   :  { %v45_v29 = vpop.permute.xlu1 %44 }
 0x7e0   :  { %vm59_vm7 = vcmp.eq.s32.totalorder %v1590_v22, %v45_v29  ;;  %47 = vperm.xlu0 %1401, %v26_v28  }
 0x7e1   :  { %v67_v30 = vsel %vm59_vm7, 1.0, %v1498_v19 }
 0x7e2   :  { %1223 = vmatprep.mubr.msk.f32.mxu0 %vm78_vm1, %v67_v30 }
 0x7e3   :  { %v51_v34 = vpop.permute.xlu1 %50 }
 0x7e4   :  { %53 = vperm.xlu0 %1401, %v28_v31   ;;  %vm61_vm8 = vcmp.eq.s32.totalorder %v1590_v22, %v51_v34 }
 0x7e5   :  { %v69_v37 = vsel %vm61_vm8, 1.0, %v1498_v19 }
 0x84e   :  { %v505_v32 = vpop.permute.xlu0 %504 }
 0x84f   :  { %v507_v33 = vmul.f32 %v1424_v16, %v505_v32 }
 0x851   :  { %509 = vrot.lane.b32.xlu1 %v507_v33, %s1500_s18 }
 0x85f   :  { %v48_v35 = vpop.permute.xlu0 %47 }
 0x860   :  { %vm60_vm9 = vcmp.eq.s32.totalorder %v1590_v22, %v48_v35 }
 0x861   :  { %v68_v36 = vsel %vm60_vm9, 1.0, %v1498_v19 }
 0x862   :  { %1224 = vmatmul.mubr.msk.f32.gmra.mrb[4].mxu0 %vm78_vm1, %v68_v36 }
 0x863   :  { %1226 = vmatprep.mubr.msk.f32.mxu0 %vm78_vm1, %v69_v37  ;;  %v54_v38 = vpop.permute.xlu0 %53 }
 0x864   :  { %vm62_vm10 = vcmp.eq.s32.totalorder %v1590_v22, %v54_v38 }
 0x865   :  { %v70_v39 = vsel %vm62_vm10, 1.0, %v1498_v19 }
 0x866   :  { %1227 = vmatmul.mubr.msk.f32.gmra.mrb[6].mxu0 %vm78_vm1, %v70_v39 }
 0x867   :  { %1270 = vmatprep.mubr.msk.f32.mxu0 %vm1497_vm0, %v1498_v19 }
 0x8c3   :  { %v510_v40 = vpop.permute.xlu1 %509 }
 0x8c4   :  { %1271 = vmatmul.mubr.msk.f32.vlgmr.msra.gmra.mrb[8].mxu0 %vm212_vm4, %v510_v40 }
 0x8c5   :  { %1372 = vmatpush3.bf16.msra.mxu0 %v1560_v13  ;;  %1292 = vmatprep.mubr.msk.f32.mxu0 %vm1497_vm0, %v1498_v19 }
 0x8c6   :  { %1373 = vmatprep.subr.bf16.mxu0 %v1496_v7 }
 0x8c9   :  { %1375 = vmatpush3.bf16.msra.mxu0 %v1572_v17 }
 0x8ca   :  { %1382 = vmatprep.subr.bf16.mxu0 %v1496_v7 }
 0x935   :  { %v1675_v22 = vpop.f32.mrb[4].mxu0 }
 0x936   :  { %v189_v41 = vpop.f32.mrb[5].mxu0 }
 0x939   :  { %v1677_v42 = vpop.f32.mrb[6].mxu0 }
 0x93a   :  { %v1679_v43 = vpop.f32.mrb[7].mxu0 }
 0x997   :  { %v579_v44 = vpop.f32.mrb[8].mxu0 }
 0x998   :  { %v580_v45 = vadd.f32 %v1636_v5, %v579_v44  ;;  %v1272_v46 = vpop.f32.mrb[9].mxu0 }
 0x99a   :  { %1427 = vtanh.f32 %v580_v45  ;;  %v1132_v48 = vmul.f32 -1.442695, %v580_v45 }
 0x99c   :  { %1429 = vpow2.f32 %v1132_v48 }
 0x9a4   :  { %v1428_v47 = vpop.eup %1427 }
 0x9a5   :  { %592 = vrot.lane.b32.xlu0 %v1428_v47, %s1499_s1 }
 0x9a6   :  { %v1430_v49 = vpop.eup %1429 }
 0x9a7   :  { %v586_v50 = vadd.f32 1.0, %v1430_v49 }
 0x9a9   :  { %1431 = vrcp.f32 %v586_v50 }
 0x9b3   :  { %v1432_v51 = vpop.eup %1431 }
 0x9b4   :  { %v590_v54 = vmul.f32 %v1432_v51, %v501_v26 }
 0xa17   :  { %v593_v52 = vpop.permute.xlu0 %592 }
 0xa18   :  { %v595_v53 = vmul.f32 %v1432_v51, %v593_v52 }
 0xa1a   :  { %597 = vrot.lane.b32.xlu1 %v595_v53, %s1500_s18 }
 0xa8c   :  { %v598_v55 = vpop.permute.xlu1 %597 }
 0xa8d   :  { %v600_v56 = vadd.f32 %v598_v55, %v590_v54 }
 0xa8f   :  { %1433 = vtanh.f32 %v600_v56 }
 0xa99   :  { %v1434_v57 = vpop.eup %1433 }
 0xa9a   :  { %603 = vrot.lane.b32.xlu0 %v1434_v57, %s1499_s1 }
 0xb0c   :  { %v604_v58 = vpop.permute.xlu0 %603 }
 0xb0d   :  { %v606_v59 = vmul.f32 %v1432_v51, %v604_v58 }
 0xb0f   :  { %608 = vrot.lane.b32.xlu1 %v606_v59, %s1500_s18 }
 0xb81   :  { %v609_v60 = vpop.permute.xlu1 %608 }
 0xb82   :  { %1282 = vmatmul.mubr.msk.f32.vlgmr.msra.gmra.mrb[6].mxu1 %vm212_vm4, %v609_v60 }
 0xb83   :  { %1378 = vmatpush3.bf16.msra.mxu1 %v1560_v13  ;;  %1303 = vmatprep.mubr.msk.f32.mxu1 %vm1497_vm0, %v1498_v19 }
 0xb84   :  { %1379 = vmatprep.subr.bf16.mxu1 %v1496_v7 }
 0xb87   :  { %1381 = vmatpush3.bf16.msra.mxu1 %v1572_v17 }
 0xb88   :  { %1388 = vmatprep.subr.bf16.mxu1 %v1496_v7 }
 0xc55   :  { %v678_v61 = vpop.f32.mrb[6].mxu1 }
 0xc56   :  { %v679_v62 = vadd.f32 %v678_v61, %v189_v41  ;;  %v1283_v63 = vpop.f32.mrb[7].mxu1 }
 0xc57   :  { %v1004_v63 = vld [vmem:[%s1754_s3 + $0x8] sm:$0xff] }
 0xc58   :  { %1435 = vtanh.f32 %v679_v62  ;;  %v1134_v1 = vmul.f32 -1.442695, %v679_v62 }
 0xc5a   :  { %1437 = vpow2.f32 %v1134_v1 }
 0xc62   :  { %v1436_v0 = vpop.eup %1435 }
 0xc63   :  { %691 = vrot.lane.b32.xlu0 %v1436_v0, %s1499_s1  ;;  %v1005_v0 = vld [vmem:[%s1754_s3 + $0x10] sm:$0xff] }
 0xc64   :  { %v1438_v2 = vpop.eup %1437 }
 0xc65   :  { %v685_v3 = vadd.f32 1.0, %v1438_v2  ;;  %v1006_v2 = vld [vmem:[%s1754_s3 + $0x18] sm:$0xff] }
 0xc67   :  { %1439 = vrcp.f32 %v685_v3  ;;  %v1392_v3 = vpack.c.bf16 %v1006_v2, %v1005_v0 }
 0xc71   :  { %v1440_v4 = vpop.eup %1439 }
 0xc72   :  { %v689_v8 = vmul.f32 %v1440_v4, %v600_v56 }
 0xcd5   :  { %v692_v5 = vpop.permute.xlu0 %691 }
 0xcd6   :  { %v694_v6 = vmul.f32 %v1440_v4, %v692_v5 }
 0xcd8   :  { %696 = vrot.lane.b32.xlu1 %v694_v6, %s1500_s18 }
 0xd4a   :  { %v697_v9 = vpop.permute.xlu1 %696 }
 0xd4b   :  { %v699_v10 = vadd.f32 %v697_v9, %v689_v8  ;;  %v1141_v9 = vld [vmem:[%s1755_s4] ss:$0 sm:$0xff] }
 0xd4d   :  { %1441 = vtanh.f32 %v699_v10 }
 0xd57   :  { %v1442_v11 = vpop.eup %1441 }
 0xd58   :  { %702 = vrot.lane.b32.xlu0 %v1442_v11, %s1499_s1 }
 0xdca   :  { %v703_v12 = vpop.permute.xlu0 %702 }
 0xdcb   :  { %v705_v14 = vmul.f32 %v1440_v4, %v703_v12 }
 0xdcd   :  { %707 = vrot.lane.b32.xlu1 %v705_v14, %s1500_s18 }
 0xe3f   :  { %v708_v15 = vpop.permute.xlu1 %707 }
 0xe40   :  { %1293 = vmatmul.mubr.msk.f32.vlgmr.msra.gmra.mrb[10].mxu0 %vm212_vm4, %v708_v15 }
 0xe41   :  { %1384 = vmatpush3.bf16.msra.mxu0 %v1560_v13  ;;  %1314 = vmatprep.mubr.msk.f32.mxu0 %vm1497_vm0, %v1498_v19 }
 0xe42   :  { %1385 = vmatprep.subr.bf16.mxu0 %v1496_v7 }
 0xe45   :  { %1387 = vmatpush3.bf16.msra.mxu0 %v1572_v17 }
 0xf13   :  { %v777_v16 = vpop.f32.mrb[10].mxu0 }
 0xf14   :  { %v778_v18 = vadd.f32 %v1675_v22, %v777_v16  ;;  %v1294_v20 = vpop.f32.mrb[11].mxu0 }
 0xf16   :  { %1443 = vtanh.f32 %v778_v18  ;;  %v1136_v23 = vmul.f32 -1.442695, %v778_v18 }
 0xf18   :  { %1445 = vpow2.f32 %v1136_v23 }
 0xf20   :  { %v1444_v21 = vpop.eup %1443 }
 0xf21   :  { %790 = vrot.lane.b32.xlu0 %v1444_v21, %s1499_s1 }
 0xf22   :  { %v1446_v24 = vpop.eup %1445 }
 0xf23   :  { %v784_v25 = vadd.f32 1.0, %v1446_v24 }
 0xf25   :  { %1447 = vrcp.f32 %v784_v25 }
 0xf2f   :  { %v1448_v13 = vpop.eup %1447 }
 0xf30   :  { %v788_v28 = vmul.f32 %v1448_v13, %v699_v10 }
 0xf93   :  { %v791_v26 = vpop.permute.xlu0 %790 }
 0xf94   :  { %v793_v27 = vmul.f32 %v1448_v13, %v791_v26 }
 0xf96   :  { %795 = vrot.lane.b32.xlu1 %v793_v27, %s1500_s18 }
0x1008   :  { %v796_v17 = vpop.permute.xlu1 %795 }
0x1009   :  { %v798_v29 = vadd.f32 %v796_v17, %v788_v28 }
0x100b   :  { %1449 = vtanh.f32 %v798_v29 }
0x1015   :  { %v1450_v30 = vpop.eup %1449 }
0x1016   :  { %801 = vrot.lane.b32.xlu0 %v1450_v30, %s1499_s1 }
0x1088   :  { %v802_v31 = vpop.permute.xlu0 %801 }
0x1089   :  { %v804_v32 = vmul.f32 %v1448_v13, %v802_v31 }
0x108b   :  { %806 = vrot.lane.b32.xlu1 %v804_v32, %s1500_s18 }
0x10fd   :  { %v807_v33 = vpop.permute.xlu1 %806 }
0x10fe   :  { %1304 = vmatmul.mubr.msk.f32.vlgmr.msra.gmra.mrb[8].mxu1 %vm212_vm4, %v807_v33 }
0x10ff   :  { %1325 = vmatprep.mubr.msk.f32.mxu1 %vm1497_vm0, %v1498_v19 }
0x11d1   :  { %v876_v34 = vpop.f32.mrb[8].mxu1 }
0x11d2   :  { %v877_v35 = vadd.f32 %v876_v34, %v1679_v43  ;;  %v1305_v36 = vpop.f32.mrb[9].mxu1 }
0x11d4   :  { %1451 = vtanh.f32 %v877_v35  ;;  %v1138_v38 = vmul.f32 -1.442695, %v877_v35 }
0x11d6   :  { %1453 = vpow2.f32 %v1138_v38 }
0x11de   :  { %v1452_v37 = vpop.eup %1451 }
0x11df   :  { %889 = vrot.lane.b32.xlu0 %v1452_v37, %s1499_s1 }
0x11e0   :  { %v1454_v39 = vpop.eup %1453 }
0x11e1   :  { %v883_v40 = vadd.f32 1.0, %v1454_v39 }
0x11e3   :  { %1455 = vrcp.f32 %v883_v40 }
0x11ed   :  { %v1456_v22 = vpop.eup %1455 }
0x11ee   :  { %v887_v45 = vmul.f32 %v1456_v22, %v798_v29 }
0x1251   :  { %v890_v41 = vpop.permute.xlu0 %889 }
0x1252   :  { %v892_v44 = vmul.f32 %v1456_v22, %v890_v41 }
0x1254   :  { %894 = vrot.lane.b32.xlu1 %v892_v44, %s1500_s18 }
0x12c6   :  { %v895_v19 = vpop.permute.xlu1 %894 }
0x12c7   :  { %v897_v46 = vadd.f32 %v895_v19, %v887_v45 }
0x12c9   :  { %1457 = vtanh.f32 %v897_v46 }
0x12d3   :  { %v1458_v43 = vpop.eup %1457 }
0x12d4   :  { %900 = vrot.lane.b32.xlu0 %v1458_v43, %s1499_s1 }
0x1346   :  { %v901_v47 = vpop.permute.xlu0 %900 }
0x1347   :  { %v903_v48 = vmul.f32 %v1456_v22, %v901_v47 }
0x1349   :  { %905 = vrot.lane.b32.xlu1 %v903_v48, %s1500_s18 }
0x13bb   :  { %v906_v49 = vpop.permute.xlu1 %905 }
0x13bc   :  { %1315 = vmatmul.mubr.msk.f32.vlgmr.msra.gmra.mrb[12].mxu0 %vm212_vm4, %v906_v49 }
0x148f   :  { %v975_v50 = vpop.f32.mrb[12].mxu0 }
0x1490   :  { %v976_v51 = vadd.f32 %v1677_v42, %v975_v50  ;;  %v1316_v52 = vpop.f32.mrb[13].mxu0  ;;  %v1003_v42 = vld [vmem:[%s1754_s3] sm:$0xff]  ;;  %s1501_s3 = smov [#allocation2]  }
0x1491   :  { %v1389_v1 = vpack.c.bf16 %v1004_v63, %v1003_v42  ;;  %s1110_s15 = sshll.u32 %s1501_s3, 4  ;;  %s1111_s15 = int_to_ptr.vmem [resolvable:$true] %s1110_s15 }
0x1492   :  { %1459 = vtanh.f32 %v976_v51  ;;  %v1140_v54 = vmul.f32 -1.442695, %v976_v51  ;;  %s1471_s4 = scalar_lea.vmem %s1111_s15, 32  ;;  %p1476_p1 = scmp.lt.s32.totalorder %s1111_s15, %s1111_s15 }
0x1493   :  { %1390 = vmatpush3.bf16.msra.mxu1 %v1389_v1  ;;  %p1472_p0 = scmp.ne.s32.totalorder %s1111_s15, %s1471_s4  ;;  %p1477_p2 = scmp.lt.s32.totalorder %s1471_s4, %s1471_s4 }
0x1494   :  { %1461 = vpow2.f32 %v1140_v54  ;;  %1391 = vmatprep.subr.bf16.mxu1 %v1496_v7 }
0x1495   :  { %p1478_p3 = por %p1477_p2, %p1476_p1 }
0x1497   :  { %1393 = vmatpush3.bf16.msra.mxu1 %v1392_v3  ;;  %p1479_p4 = pnand %p1478_p3, %p1472_p0 }
0x149c   :  { %v1460_v53 = vpop.eup %1459 }
0x149d   :  { %988 = vrot.lane.b32.xlu0 %v1460_v53, %s1499_s1 }
0x149e   :  { %v1462_v55 = vpop.eup %1461 }
0x149f   :  { %v982_v56 = vadd.f32 1.0, %v1462_v55 }
0x14a1   :  { %1463 = vrcp.f32 %v982_v56 }
0x14ab   :  { %v1464_v57 = vpop.eup %1463 }
0x14ac   :  { %v986_v60 = vmul.f32 %v1464_v57, %v897_v46 }
0x150f   :  { %v989_v58 = vpop.permute.xlu0 %988 }
0x1510   :  { %v991_v59 = vmul.f32 %v1464_v57, %v989_v58 }
0x1512   :  { %993 = vrot.lane.b32.xlu1 %v991_v59, %s1500_s18 }
0x1584   :  { %v994_v61 = vpop.permute.xlu1 %993 }
0x1585   :  { %v996_v62 = vadd.f32 %v994_v61, %v986_v60 }
0x1587   :  { %1465 = vtanh.f32 %v996_v62 }
0x1591   :  { %v1466_v4 = vpop.eup %1465 }
0x1592   :  { %999 = vrot.lane.b32.xlu0 %v1466_v4, %s1499_s1 }
0x1604   :  { %v1000_v5 = vpop.permute.xlu0 %999 }
0x1605   :  { %v1002_v6 = vmul.f32 %v1464_v57, %v1000_v5 }
0x1607   :  { %1015 = vrot.lane.b32.xlu1 %v1002_v6, %s1500_s18 }
0x1679   :  { %v1016_v8 = vpop.permute.xlu1 %1015 }
0x167a   :  { %1326 = vmatmul.mubr.msk.f32.vlgmr.msra.gmra.mrb[10].mxu1 %vm212_vm4, %v1016_v8 }
0x174d   :  { %v1085_v10 = vpop.f32.mrb[10].mxu1 }
0x174e   :  { %v1086_v11 = vadd.f32 %v1141_v9, %v1085_v10  ;;  %v1327_v12 = vpop.f32.mrb[11].mxu1 }
0x1750   :  { %v1090_v7 = vsel %vm1089_vm11, %v1086_v11, -inf }
0x1751   :  { %1091 = vmax.xlane.f32.xlu0 %v1090_v7 }
0x17de   :  { %v1092_v14 = vpop.xlane.xlu0 %1091 }
0x17df   :  { %v1093_v15 = vsub.f32 %v1086_v11, %v1092_v14 }
0x17e1   :  { %v1094_v16 = vmul.f32 1.442695, %v1093_v15 }
0x17e3   :  { %1467 = vpow2.f32 %v1094_v16 }
0x17ed   :  { %v1468_v18 = vpop.eup %1467 }
0x17ee   :  { %v1096_v20 = vsel %vm1089_vm11, %v1468_v18, 0.0 }
0x17ef   :  { %1097 = vadd.xlane.f32.xlu1 %v1096_v20 }
0x187c   :  { %v1098_v21 = vpop.xlane.xlu1 %1097 }
0x187d   :  { %1469 = vlog2.f32 %v1098_v21 }
0x1887   :  { %v1470_v23 = vpop.eup %1469 }
0x1888   :  { %v1100_v24 = vmul.f32 0.6931472, %v1470_v23 }
0x188a   :  { %v1101_v25 = vsub.f32 %v1093_v15, %v1100_v24 }
0x188c   :  { %1103 = vst.msk [vmem:[#allocation2] sm:$0x3] %vm1102_vm12, %v1101_v25 }
0x188d   :  { %1482 = shalt.err (!%p1479_p4)
}
0x188e   :  { %s1483_s17 = scalar_lea.hbm %s1756_s5, 32 }
0x188f   :  { %p1484_p5 = scmp.ne.s32.totalorder %s1756_s5, %s1483_s17  ;;  %p1487_p6 = scmp.lt.u32.totalorder %s1483_s17, %s1756_s5 }
0x1891   :  { %p1489_p7 = pnand %p1487_p6, %p1484_p5 }
0x1893   :  { %1492 = shalt.err (!%p1489_p7)
}
0x1894   :  { %1113 = dma.vmem_to_hbm [thread:$0]  %s1111_s15, 32, %s1756_s5, [#allocation3]  }
0x1895   :  { %1493 = dma.done.wait [#allocation3], 32  }
0x1896   :  { %1494 = vsyncadd [#allocation3], 4294967264 }
0x1897   :  { %1117 = vsyncpa [#allocation3], 1 }

</bundles_post_ra>
